<compile_context>
chip_gen: v7x
topology: tpu7x:2x2x1
jax: 0.10.0
libtpu: 0.0.40
codegen_flags: <defaults>
</compile_context>

<pallas_src>
import functools

import jax
import jax.numpy as jnp
from jax.experimental import pallas as pl
from jax.experimental.pallas import tpu as pltpu


def _round_up(v, m):
    return ((v + m - 1) // m) * m


def _center_loss_kernel(labels_ref, x_ref, c2_ref, cnorm_ref, out_ref,
                        x_norm_sc, own_sc, rowsum_sc, *,
                        delta, num_classes, block_c):
    # program_id / num_programs only at top level (interpreter-safe).
    ci = pl.program_id(1)
    last_ci = pl.num_programs(1) - 1

    @pl.when(ci == 0)
    def _init():
        x_f32 = x_ref[...].astype(jnp.float32)
        x_norm_sc[...] = jnp.sum(x_f32 * x_f32, axis=1, keepdims=True)
        own_sc[...] = jnp.zeros_like(own_sc)
        rowsum_sc[...] = jnp.zeros_like(rowsum_sc)

    # x @ (2*centers).T on the MXU (native dtype operands, f32 accumulation).
    xc2 = jax.lax.dot_general(x_ref[...], c2_ref[...], (((1,), (1,)), ((), ())),
                              preferred_element_type=jnp.float32)     # (tB, tC)

    # t[i, c] = ||c_c||^2 - 2 x_i·c_c  (dist minus the ||x||^2 term).
    # Padded (zero) center columns contribute exactly 0 to both reductions.
    t = cnorm_ref[...] - xc2                                          # (tB, tC)

    class_ids = ci * block_c + jax.lax.broadcasted_iota(
        jnp.int32, (1, t.shape[1]), 1)                                # (1, tC)
    onehot = class_ids == labels_ref[...]                             # (tB, tC)

    own_sc[...] += jnp.sum(jnp.where(onehot, t, 0.0), axis=1, keepdims=True)
    rowsum_sc[...] += jnp.sum(t, axis=1, keepdims=True)

    @pl.when(ci == last_ci)
    def _finalize():
        x_norm = x_norm_sc[...]                                       # (tB, 1)
        own_raw = x_norm + own_sc[...]                                # dist to own center
        rowsum = num_classes * x_norm + rowsum_sc[...]                # sum over real classes
        sum_other = jnp.maximum(rowsum - own_raw, 0.0)
        own = jnp.maximum(own_raw, 0.0)
        ratio = own / (sum_other + delta)                             # padded rows -> 0
        partial = jnp.sum(ratio)                                      # per-batch-tile partial
        out_ref[...] = jnp.broadcast_to(partial, out_ref.shape).astype(jnp.float32)


def center_loss(labels, x, centers, delta=1e-6, *, block_b=256, block_c=2048):
    """labels: (B,) int, x: (B, D), centers: (C, D) -> scalar float32 loss."""
    batch, feat_dim = x.shape
    num_classes = centers.shape[0]

    DP = _round_up(feat_dim, 128)

    # --- batch tile: big for arithmetic intensity, but keep >=2 tiles when the
    # batch allows it so the "parallel" axis shards across cores (v7x dual-TC).
    tB = min(block_b, _round_up(batch, 8))
    if batch > 8 and _round_up(batch, tB) // tB < 2:
        tB = max(8, _round_up((batch + 1) // 2, 8))

    # --- class tile: big so each centers DMA step moves plenty of bytes.
    tC = min(block_c, _round_up(num_classes, 128))

    # --- explicit VMEM budget (double-buffered inputs + (tB,tC) f32 temporaries),
    # conservative enough for v5e/v6e (128 MiB) and v7x (64 MiB).
    x_bytes = jnp.dtype(x.dtype).itemsize
    c_bytes = jnp.dtype(centers.dtype).itemsize

    def est_bytes(tb, tc):
        ins = 2 * (tb * DP * x_bytes + tc * DP * c_bytes + tc * 4 + tb * 4)
        tmps = 3 * tb * tc * 4            # xc2 / t / selected-t live f32 temporaries
        scr = 3 * tb * 4 + 2 * 128 * 4
        return ins + tmps + scr

    budget = 40 * 1024 * 1024
    while est_bytes(tB, tC) > budget and tC > 128:
        tC = max(128, _round_up(tC // 2, 128))
    while est_bytes(tB, tC) > budget and tB > 8:
        tB = max(8, _round_up(tB // 2, 8))
    vmem_limit = int(min(48 * 1024 * 1024,
                         max(16 * 1024 * 1024, est_bytes(tB, tC) + (4 << 20))))

    BP = _round_up(batch, tB)
    CP = _round_up(num_classes, tC)
    n_btiles = BP // tB
    n_ctiles = CP // tC

    # Zero feature padding is exact; padded classes are zero rows (contribute 0);
    # padded batch rows are zero with label -1 (ratio is exactly 0 in-kernel).
    x_p = jnp.pad(x, ((0, BP - batch), (0, DP - feat_dim)))
    c2_p = jnp.pad(centers * 2, ((0, CP - num_classes), (0, DP - feat_dim)))
    cnorm = jnp.sum(centers.astype(jnp.float32) ** 2, axis=1)
    cnorm_p = jnp.pad(cnorm, (0, CP - num_classes)).reshape(1, CP)
    labels_p = jnp.pad(labels.astype(jnp.int32), (0, BP - batch),
                       constant_values=-1).reshape(BP, 1)

    kernel = functools.partial(_center_loss_kernel, delta=float(delta),
                               num_classes=num_classes, block_c=tC)

    partials = pl.pallas_call(
        kernel,
        out_shape=jax.ShapeDtypeStruct((n_btiles, 1, 128), jnp.float32),
        grid_spec=pltpu.PrefetchScalarGridSpec(
            num_scalar_prefetch=0,
            grid=(n_btiles, n_ctiles),
            in_specs=[
                pl.BlockSpec((tB, 1), lambda bi, ci: (bi, 0)),    # labels
                pl.BlockSpec((tB, DP), lambda bi, ci: (bi, 0)),   # x
                pl.BlockSpec((tC, DP), lambda bi, ci: (ci, 0)),   # 2 * centers
                pl.BlockSpec((1, tC), lambda bi, ci: (0, ci)),    # ||centers||^2
            ],
            out_specs=pl.BlockSpec((1, 1, 128), lambda bi, ci: (bi, 0, 0)),
            scratch_shapes=[
                pltpu.VMEM((tB, 1), jnp.float32),   # ||x||^2
                pltpu.VMEM((tB, 1), jnp.float32),   # own-center accumulator
                pltpu.VMEM((tB, 1), jnp.float32),   # row-sum accumulator
            ],
        ),
        compiler_params=pltpu.CompilerParams(
            dimension_semantics=("parallel", "arbitrary"),
            vmem_limit_bytes=vmem_limit),
    )(labels_p, x_p, c2_p, cnorm_p)

    return jnp.sum(partials[:, 0, 0]) * 0.5 / batch


def center_loss_ref(labels, x, centers, delta=1e-6):
    """Pure-JAX reference mirroring the PyTorch forward()."""
    C = centers.shape[0]
    mask = jax.nn.one_hot(labels, C, dtype=jnp.float32)
    dist_own = jnp.sum((x - centers[labels]) ** 2, axis=1)
    dist_all = jnp.sum((x[:, None, :] - centers[None, :, :]) ** 2, axis=2)
    sum_other = jnp.sum(dist_all * (1.0 - mask), axis=1)
    return jnp.mean(dist_own / (sum_other + delta)) * 0.5


if __name__ == "__main__":
    num_classes = 10
    feat_dim = 32
    batch = 4

    key = jax.random.PRNGKey(0)
    k_centers, k_x, k_labels = jax.random.split(key, 3)

    # nn.Parameter(torch.randn(num_classes, feat_dim)) -> deterministic normal init.
    centers = jax.random.normal(k_centers, (num_classes, feat_dim), dtype=jnp.float32)
    x = jax.random.normal(k_x, (batch, feat_dim), dtype=jnp.float32)
    labels = jax.random.randint(k_labels, (batch,), 0, num_classes, dtype=jnp.int32)

    loss = center_loss(labels, x, centers)
    jax.block_until_ready(loss)

    loss_ref = center_loss_ref(labels, x, centers)
    # Slightly loosened rtol: matmul-identity distances vs. direct (x-c)^2.
    assert jnp.allclose(loss, loss_ref, rtol=2e-3, atol=1e-6), (loss, loss_ref)

    print("KERNEL_OK")
</pallas_src>

<mosaic_0001>
module attributes {stable_mosaic.version = 11 : i64} {
  func.func @_center_loss_kernel(%arg0: i32, %arg1: i32, %arg2: memref<8x1xi32, #tpu.memory_space<vmem>>, %arg3: memref<8x128xf32, #tpu.memory_space<vmem>>, %arg4: memref<128x128xf32, #tpu.memory_space<vmem>>, %arg5: memref<1x128xf32, #tpu.memory_space<vmem>>, %arg6: memref<1x1x128xf32, #tpu.memory_space<vmem>>, %arg7: memref<8x1xf32, #tpu.memory_space<vmem>>, %arg8: memref<8x1xf32, #tpu.memory_space<vmem>>, %arg9: memref<8x1xf32, #tpu.memory_space<vmem>>) attributes {dimension_semantics = [#tpu.dimension_semantics<parallel>, #tpu.dimension_semantics<arbitrary>], iteration_bounds = array<i64: 1, 1>, scalar_prefetch = 0 : i64, scratch_operands = 3 : i64, tpu.core_type = #tpu.core_type<tc>, window_params = [{transform_indices = @transform_0, window_bounds = array<i64: 8, 1>}, {transform_indices = @transform_1, window_bounds = array<i64: 8, 128>}, {transform_indices = @transform_2, window_bounds = array<i64: 128, 128>}, {transform_indices = @transform_3, window_bounds = array<i64: 1, 128>}, {transform_indices = @transform_4, window_bounds = array<i64: 1, 1, 128>}]} {
    %c0_i32 = arith.constant 0 : i32
    %0 = arith.cmpi eq, %arg1, %c0_i32 : i32
    %1 = arith.extui %0 : i1 to i32
    %c0_i32_0 = arith.constant 0 : i32
    %2 = arith.cmpi ne, %1, %c0_i32_0 : i32
    scf.if %2 {
      %c0_21 = arith.constant 0 : index
      %c0_22 = arith.constant 0 : index
      %32 = vector.load %arg3[%c0_21, %c0_22] : memref<8x128xf32, #tpu.memory_space<vmem>>, vector<8x128xf32>
      %33 = arith.mulf %32, %32 : vector<8x128xf32>
      %cst_23 = arith.constant dense<0.000000e+00> : vector<8xf32>
      %34 = vector.multi_reduction <add>, %33, %cst_23 [1] : vector<8x128xf32> to vector<8xf32>
      %35 = vector.shape_cast %34 : vector<8xf32> to vector<8x1xf32>
      %c0_24 = arith.constant 0 : index
      %c0_25 = arith.constant 0 : index
      %36 = vector.load %arg7[%c0_24, %c0_25] : memref<8x1xf32, #tpu.memory_space<vmem>>, vector<8x1xf32>
      tpu.vector_store %arg7[%c0_24, %c0_25], %35 {strides = array<i32>} : memref<8x1xf32, #tpu.memory_space<vmem>>, vector<8x1xf32>,
      %cst_26 = arith.constant 0.000000e+00 : f32
      %37 = vector.broadcast %cst_26 : f32 to vector<8x1xf32>
      %c0_27 = arith.constant 0 : index
      %c0_28 = arith.constant 0 : index
      %38 = vector.load %arg8[%c0_27, %c0_28] : memref<8x1xf32, #tpu.memory_space<vmem>>, vector<8x1xf32>
      tpu.vector_store %arg8[%c0_27, %c0_28], %37 {strides = array<i32>} : memref<8x1xf32, #tpu.memory_space<vmem>>, vector<8x1xf32>,
      %cst_29 = arith.constant 0.000000e+00 : f32
      %39 = vector.broadcast %cst_29 : f32 to vector<8x1xf32>
      %c0_30 = arith.constant 0 : index
      %c0_31 = arith.constant 0 : index
      %40 = vector.load %arg9[%c0_30, %c0_31] : memref<8x1xf32, #tpu.memory_space<vmem>>, vector<8x1xf32>
      tpu.vector_store %arg9[%c0_30, %c0_31], %39 {strides = array<i32>} : memref<8x1xf32, #tpu.memory_space<vmem>>, vector<8x1xf32>,
    } else {
    }
    %c0 = arith.constant 0 : index
    %c0_1 = arith.constant 0 : index
    %3 = vector.load %arg3[%c0, %c0_1] : memref<8x128xf32, #tpu.memory_space<vmem>>, vector<8x128xf32>
    %c0_2 = arith.constant 0 : index
    %c0_3 = arith.constant 0 : index
    %4 = vector.load %arg4[%c0_2, %c0_3] : memref<128x128xf32, #tpu.memory_space<vmem>>, vector<128x128xf32>
    %cst = arith.constant dense<0.000000e+00> : vector<8x128xf32>
    %5 = tpu.matmul %3, %4, %cst {dimension_numbers = #tpu.dot_dimension_numbers<[1], [1], [0], [0], [0, 0, 1, 0], [], []>} : vector<8x128xf32>, vector<128x128xf32>, vector<8x128xf32> -> vector<8x128xf32>
    %c0_4 = arith.constant 0 : index
    %c0_5 = arith.constant 0 : index
    %6 = vector.load %arg5[%c0_4, %c0_5] : memref<1x128xf32, #tpu.memory_space<vmem>>, vector<1x128xf32>
    %7 = vector.broadcast %6 : vector<1x128xf32> to vector<8x128xf32>
    %8 = arith.subf %7, %5 : vector<8x128xf32>
    %c128_i32 = arith.constant 128 : i32
    %9 = arith.muli %arg1, %c128_i32 : i32
    %10 = tpu.iota {dimensions = array<i32: 1>} : vector<1x128xi32>
    %11 = vector.broadcast %9 : i32 to vector<1x128xi32>
    %12 = arith.addi %11, %10 : vector<1x128xi32>
    %c0_6 = arith.constant 0 : index
    %c0_7 = arith.constant 0 : index
    %13 = vector.load %arg2[%c0_6, %c0_7] : memref<8x1xi32, #tpu.memory_space<vmem>>, vector<8x1xi32>
    %14 = vector.broadcast %12 : vector<1x128xi32> to vector<8x128xi32>
    %15 = vector.broadcast %13 : vector<8x1xi32> to vector<8x128xi32>
    %16 = arith.cmpi eq, %14, %15 : vector<8x128xi32>
    %c0_8 = arith.constant 0 : index
    %c0_9 = arith.constant 0 : index
    %17 = vector.load %arg8[%c0_8, %c0_9] : memref<8x1xf32, #tpu.memory_space<vmem>>, vector<8x1xf32>
    %cst_10 = arith.constant 0.000000e+00 : f32
    %18 = vector.broadcast %cst_10 : f32 to vector<8x128xf32>
    %19 = arith.select %16, %8, %18 : vector<8x128xi1>, vector<8x128xf32>
    %cst_11 = arith.constant dense<0.000000e+00> : vector<8xf32>
    %20 = vector.multi_reduction <add>, %19, %cst_11 [1] : vector<8x128xf32> to vector<8xf32>
    %21 = vector.shape_cast %20 : vector<8xf32> to vector<8x1xf32>
    %22 = arith.addf %17, %21 : vector<8x1xf32>
    %c0_12 = arith.constant 0 : index
    %c0_13 = arith.constant 0 : index
    %23 = vector.load %arg8[%c0_12, %c0_13] : memref<8x1xf32, #tpu.memory_space<vmem>>, vector<8x1xf32>
    tpu.vector_store %arg8[%c0_12, %c0_13], %22 {strides = array<i32>} : memref<8x1xf32, #tpu.memory_space<vmem>>, vector<8x1xf32>,
    %c0_14 = arith.constant 0 : index
    %c0_15 = arith.constant 0 : index
    %24 = vector.load %arg9[%c0_14, %c0_15] : memref<8x1xf32, #tpu.memory_space<vmem>>, vector<8x1xf32>
    %cst_16 = arith.constant dense<0.000000e+00> : vector<8xf32>
    %25 = vector.multi_reduction <add>, %8, %cst_16 [1] : vector<8x128xf32> to vector<8xf32>
    %26 = vector.shape_cast %25 : vector<8xf32> to vector<8x1xf32>
    %27 = arith.addf %24, %26 : vector<8x1xf32>
    %c0_17 = arith.constant 0 : index
    %c0_18 = arith.constant 0 : index
    %28 = vector.load %arg9[%c0_17, %c0_18] : memref<8x1xf32, #tpu.memory_space<vmem>>, vector<8x1xf32>
    tpu.vector_store %arg9[%c0_17, %c0_18], %27 {strides = array<i32>} : memref<8x1xf32, #tpu.memory_space<vmem>>, vector<8x1xf32>,
    %c0_i32_19 = arith.constant 0 : i32
    %29 = arith.cmpi eq, %arg1, %c0_i32_19 : i32
    %30 = arith.extui %29 : i1 to i32
    %c0_i32_20 = arith.constant 0 : i32
    %31 = arith.cmpi ne, %30, %c0_i32_20 : i32
    scf.if %31 {
      %c0_21 = arith.constant 0 : index
      %c0_22 = arith.constant 0 : index
      %32 = vector.load %arg7[%c0_21, %c0_22] : memref<8x1xf32, #tpu.memory_space<vmem>>, vector<8x1xf32>
      %c0_23 = arith.constant 0 : index
      %c0_24 = arith.constant 0 : index
      %33 = vector.load %arg8[%c0_23, %c0_24] : memref<8x1xf32, #tpu.memory_space<vmem>>, vector<8x1xf32>
      %34 = arith.addf %32, %33 : vector<8x1xf32>
      %cst_25 = arith.constant 1.000000e+01 : f32
      %35 = vector.broadcast %cst_25 : f32 to vector<8x1xf32>
      %36 = arith.mulf %35, %32 : vector<8x1xf32>
      %c0_26 = arith.constant 0 : index
      %c0_27 = arith.constant 0 : index
      %37 = vector.load %arg9[%c0_26, %c0_27] : memref<8x1xf32, #tpu.memory_space<vmem>>, vector<8x1xf32>
      %38 = arith.addf %36, %37 : vector<8x1xf32>
      %39 = arith.subf %38, %34 : vector<8x1xf32>
      %cst_28 = arith.constant 0.000000e+00 : f32
      %40 = vector.broadcast %cst_28 : f32 to vector<8x1xf32>
      %41 = arith.maximumf %39, %40 : vector<8x1xf32>
      %cst_29 = arith.constant 0.000000e+00 : f32
      %42 = vector.broadcast %cst_29 : f32 to vector<8x1xf32>
      %43 = arith.maximumf %34, %42 : vector<8x1xf32>
      %cst_30 = arith.constant 9.99999997E-7 : f32
      %44 = vector.broadcast %cst_30 : f32 to vector<8x1xf32>
      %45 = arith.addf %41, %44 : vector<8x1xf32>
      %46 = arith.divf %43, %45 : vector<8x1xf32>
      %47 = vector.shape_cast %46 : vector<8x1xf32> to vector<1x8x1xf32>
      %cst_31 = arith.constant dense<0.000000e+00> : vector<1xf32>
      %48 = vector.multi_reduction <add>, %47, %cst_31 [1, 2] : vector<1x8x1xf32> to vector<1xf32>
      %49 = vector.shape_cast %48 : vector<1xf32> to vector<1x1x1xf32>
      %50 = vector.extract %49[0, 0, 0] : f32 from vector<1x1x1xf32>
      %51 = vector.broadcast %50 : f32 to vector<1x1x128xf32>
      %c0_32 = arith.constant 0 : index
      %c0_33 = arith.constant 0 : index
      %c0_34 = arith.constant 0 : index
      %52 = vector.load %arg6[%c0_32, %c0_33, %c0_34] : memref<1x1x128xf32, #tpu.memory_space<vmem>>, vector<1x1x128xf32>
      tpu.vector_store %arg6[%c0_32, %c0_33, %c0_34], %51 {strides = array<i32>} : memref<1x1x128xf32, #tpu.memory_space<vmem>>, vector<1x1x128xf32>,
    } else {
    }
    return
  }
  func.func @transform_0(%arg0: i32, %arg1: i32) -> (i32, i32) {
    %c0_i32 = arith.constant 0 : i32
    %c0_i32_0 = arith.constant 0 : i32
    return %arg0, %c0_i32 : i32, i32
  }
  func.func @transform_1(%arg0: i32, %arg1: i32) -> (i32, i32) {
    %c0_i32 = arith.constant 0 : i32
    %c0_i32_0 = arith.constant 0 : i32
    return %arg0, %c0_i32 : i32, i32
  }
  func.func @transform_2(%arg0: i32, %arg1: i32) -> (i32, i32) {
    %c0_i32 = arith.constant 0 : i32
    %c0_i32_0 = arith.constant 0 : i32
    return %arg1, %c0_i32 : i32, i32
  }
  func.func @transform_3(%arg0: i32, %arg1: i32) -> (i32, i32) {
    %c0_i32 = arith.constant 0 : i32
    %c0_i32_0 = arith.constant 0 : i32
    return %c0_i32, %arg1 : i32, i32
  }
  func.func @transform_4(%arg0: i32, %arg1: i32) -> (i32, i32, i32) {
    %c0_i32 = arith.constant 0 : i32
    %c0_i32_0 = arith.constant 0 : i32
    %c0_i32_1 = arith.constant 0 : i32
    return %arg0, %c0_i32, %c0_i32_0 : i32, i32, i32
  }
}

</mosaic_0001>

<bundles_post_ra>
// kernel: tpu_custom_call.1
= control target key start
LH: loop header
LB: loop body
LE: loop exit
PB: predicated region body
PF: predicated region fallthrough
CT: control target
= control target key end

     0   :  { %9 = vsyncpa [#allocation6], 0  ;;  %s413_s0 = inlined_call_operand.vmem [shape: s32[8,1], index: 0, kind: input, shape index: {}]   ;;  %s414_s1 = inlined_call_operand.vmem [shape: f32[8,128], index: 1, kind: input, shape index: {}]   ;;  %s415_s2 = inlined_call_operand.hbm [shape: f32[128,128], index: 2, kind: input, shape index: {}]   ;;  %s416_s3 = inlined_call_operand.vmem [shape: f32[1,128], index: 3, kind: input, shape index: {}]   ;;  %s417_s4 = inlined_call_operand.hbm [shape: f32[1,1,128], index: 4, kind: output, shape index: {}]  }
   0x1   :  { %10 = vsyncpa [#allocation7], 0  ;;  %s341_s15 = smov [#allocation5]   ;;  %s293_s19 = scalar_lea.hbm %s415_s2, 2048 }
   0x2   :  { %s20_s16 = sshll.u32 %s341_s15, 4  ;;  %p294_p0 = scmp.ne.s32.totalorder %s415_s2, %s293_s19  ;;  %s21_s16 = int_to_ptr.vmem [resolvable:$true] %s20_s16 }
   0x3   :  { %p297_p1 = scmp.lt.u32.totalorder %s293_s19, %s415_s2 }
   0x5   :  { %p299_p2 = pnand %p297_p1, %p294_p0 }
   0x7   :  { %302 = shalt.err (!%p299_p2)
}
   0x8   :  { %s303_s24 = scalar_lea.vmem %s21_s16, 2048  ;;  %p308_p4 = scmp.lt.s32.totalorder %s21_s16, %s21_s16 }
   0x9   :  { %p304_p3 = scmp.ne.s32.totalorder %s21_s16, %s303_s24  ;;  %p309_p5 = scmp.lt.s32.totalorder %s303_s24, %s303_s24 }
   0xb   :  { %p310_p6 = por %p309_p5, %p308_p4 }
   0xd   :  { %p311_p7 = pnand %p310_p6, %p304_p3 }
   0xf   :  { %314 = shalt.err (!%p311_p7)
}
  0x10   :  { %s342_s25 = smov 128   ;;  %s343_s26 = smov 8  }
  0x11   :  { %26 = dma.hbm_to_vmem [thread:$0]  %s415_s2, 2048, %s21_s16, [#allocation6], %s342_s25, %s342_s25, %s343_s26  }
  0x12   :  { %337 = dma.done.wait [#allocation6], 2048  }
  0x13   :  { %338 = vsyncadd [#allocation6], 4294965248  ;;  %vm40_vm0 = vcmask 7168   ;;  %v344_v0 = vmov 0.0|0.0   ;;  %v345_v1 = vmov 0.0   ;;  %vm346_vm1 = vmmov 0  }
  0x14   :  { %256 = vmatprep.subr.bf16.mxu0 %v344_v0  ;;  %42 = vst.msk [vmem:[#allocation3] sm:$0xff] %vm40_vm0, %v345_v1  ;;  %43 = vst.msk [vmem:[#allocation4] sm:$0xff] %vm40_vm0, %v345_v1  ;;  %253 = vmatprep.mubr.msk.f32.mxu0 %vm346_vm1, %v345_v1  ;;  %v347_v2 = vmov 0   ;;  %v45_v3 = vld [vmem:[#allocation5] sm:$0xff]  ;;  %v46_v4 = vld [vmem:[#allocation5 + $0x8] sm:$0xff]  ;;  %v140_v30 = vlaneseq }
  0x15   :  { %290 = vset.pattern.permute.xlu0 %v347_v2  ;;  %v257_v5 = vpack.c.bf16 %v46_v4, %v45_v3  ;;  %v47_v6 = vld [vmem:[#allocation5 + $0x10] sm:$0xff]  ;;  %v48_v7 = vld [vmem:[#allocation5 + $0x18] sm:$0xff]  ;;  %v49_v10 = vld [vmem:[#allocation5 + $0x20] sm:$0xff] }
  0x16   :  { %v144_v8 = vld [vmem:[%s413_s0] sm:$0xff]  ;;  %v260_v9 = vpack.c.bf16 %v48_v7, %v47_v6  ;;  %v50_v11 = vld [vmem:[#allocation5 + $0x28] sm:$0xff]  ;;  %v52_v14 = vld [vmem:[#allocation5 + $0x38] sm:$0xff]  ;;  %v141_v31 = vand.u32 127, %v140_v30 }
  0x17   :  { %258 = vmatpush3.bf16.xpose.msra.mxu0 %v257_v5  ;;  %146 = vperm.xlu0 %290, %v144_v8   ;;  %v263_v12 = vpack.c.bf16 %v50_v11, %v49_v10  ;;  %v51_v13 = vld [vmem:[#allocation5 + $0x30] sm:$0xff]  ;;  %v53_v16 = vld [vmem:[#allocation5 + $0x40] sm:$0xff]  ;;  %v54_v17 = vld [vmem:[#allocation5 + $0x48] sm:$0xff] }
  0x18   :  { %259 = vmatprep.subr.bf16.mxu0 %v344_v0  ;;  %v266_v15 = vpack.c.bf16 %v52_v14, %v51_v13  ;;  %v269_v18 = vpack.c.bf16 %v54_v17, %v53_v16  ;;  %v55_v19 = vld [vmem:[#allocation5 + $0x50] sm:$0xff]  ;;  %v56_v20 = vld [vmem:[#allocation5 + $0x58] sm:$0xff]  ;;  %v57_v22 = vld [vmem:[#allocation5 + $0x60] sm:$0xff] }
  0x19   :  { %v272_v21 = vpack.c.bf16 %v56_v20, %v55_v19  ;;  %v58_v23 = vld [vmem:[#allocation5 + $0x68] sm:$0xff]  ;;  %v59_v25 = vld [vmem:[#allocation5 + $0x70] sm:$0xff]  ;;  %v60_v26 = vld [vmem:[#allocation5 + $0x78] sm:$0xff] }
  0x1a   :  { %v275_v24 = vpack.c.bf16 %v58_v23, %v57_v22  ;;  %v278_v27 = vpack.c.bf16 %v60_v26, %v59_v25  ;;  %v44_v28 = vld [vmem:[%s414_s1] sm:$0xff]  ;;  %s348_s1 = smov [#allocation8]  }
  0x1b   :  { %v37_v29 = vmul.f32 %v44_v28, %v44_v28  ;;  %v203_v33 = vld [vmem:[%s416_s3] ss:$0 sm:$0xff]  ;;  %v156_v42 = vld [vmem:[#allocation4] sm:$0xff]  ;;  %s194_s3 = sshll.u32 %s348_s1, 4  ;;  %s195_s3 = int_to_ptr.vmem [resolvable:$true] %s194_s3 }
  0x1c   :  { %v149_v39 = vld [vmem:[#allocation3] sm:$0xff]  ;;  %s315_s8 = scalar_lea.vmem %s195_s3, 16  ;;  %s319_s9 = scalar_lea.vmem %s195_s3, 32 }
  0x1d   :  { %p316_p8 = scmp.ne.s32.totalorder %s195_s3, %s315_s8  ;;  %p320_p9 = scmp.lt.s32.totalorder %s195_s3, %s195_s3 }
  0x1e   :  { %p321_p10 = scmp.lt.s32.totalorder %s319_s9, %s315_s8 }
  0x1f   :  { %261 = vmatpush3.bf16.xpose.msra.mxu0 %v260_v9 }
  0x20   :  { %262 = vmatprep.subr.bf16.mxu0 %v344_v0  ;;  %p322_p11 = por %p321_p10, %p320_p9 }
  0x22   :  { %p323_p12 = pnand %p322_p11, %p316_p8 }
  0x27   :  { %264 = vmatpush3.bf16.xpose.msra.mxu0 %v263_v12 }
  0x28   :  { %265 = vmatprep.subr.bf16.mxu0 %v344_v0 }
  0x2f   :  { %267 = vmatpush3.bf16.xpose.msra.mxu0 %v266_v15 }
  0x30   :  { %268 = vmatprep.subr.bf16.mxu0 %v344_v0 }
  0x36   :  { %38 = vadd.xlane.f32.xlu0 %v37_v29 }
  0x37   :  { %270 = vmatpush3.bf16.xpose.msra.mxu0 %v269_v18 }
  0x38   :  { %271 = vmatprep.subr.bf16.mxu0 %v344_v0 }
  0x3f   :  { %273 = vmatpush3.bf16.xpose.msra.mxu0 %v272_v21 }
  0x40   :  { %274 = vmatprep.subr.bf16.mxu0 %v344_v0 }
  0x47   :  { %276 = vmatpush3.bf16.xpose.msra.mxu0 %v275_v24 }
  0x48   :  { %277 = vmatprep.subr.bf16.mxu0 %v344_v0 }
  0x4f   :  { %279 = vmatpush3.bf16.xpose.msra.mxu0 %v278_v27 }
  0x56   :  { %254 = vmatmul.mubr.f32.vlgmr.msra.gmra.mrb[0].mxu0 %v44_v28 }
  0x96   :  { %v147_v32 = vpop.permute.xlu0 %146 }
  0x97   :  { %vm148_vm2 = vcmp.eq.s32.totalorder %v141_v31, %v147_v32 }
  0xc3   :  { %v39_v38 = vpop.xlane.xlu0 %38 }
  0xc4   :  { %41 = vst.msk [vmem:[#allocation2] sm:$0xff] %vm40_vm0, %v39_v38 }
  0xcb   :  { %v164_v45 = vld [vmem:[#allocation2] sm:$0xff] }
  0xcc   :  { %v167_v46 = vmul.f32 10.0, %v164_v45 }
 0x129   :  { %v127_v34 = vpop.f32.mrb[0].mxu0 }
 0x12a   :  { %v138_v35 = vsub.f32 %v203_v33, %v127_v34  ;;  %v255_v36 = vpop.f32.mrb[1].mxu0 }
 0x12c   :  { %v150_v37 = vsel %vm148_vm2, %v138_v35, 0.0 }
 0x12d   :  { %151 = vadd.xlane.f32.xlu1 %v150_v37 }
 0x131   :  { %157 = vadd.xlane.f32.xlu1 %v138_v35 }
 0x1ba   :  { %v152_v40 = vpop.xlane.xlu1 %151 }
 0x1bb   :  { %v153_v41 = vadd.f32 %v152_v40, %v149_v39 }
 0x1bd   :  { %155 = vst.msk [vmem:[#allocation3] sm:$0xff] %vm40_vm0, %v153_v41 }
 0x1be   :  { %v158_v43 = vpop.xlane.xlu1 %157 }
 0x1bf   :  { %v159_v44 = vadd.f32 %v158_v43, %v156_v42 }
 0x1c1   :  { %160 = vst.msk [vmem:[#allocation4] sm:$0xff] %vm40_vm0, %v159_v44 }
 0x1c4   :  { %v165_v47 = vld [vmem:[#allocation3] sm:$0xff] }
 0x1c5   :  { %v166_v49 = vadd.f32 %v165_v47, %v164_v45 }
 0x1c7   :  { %v172_v54 = vmax.f32 %v166_v49, 0.0 }
 0x1c8   :  { %v168_v48 = vld [vmem:[#allocation4] sm:$0xff] }
 0x1c9   :  { %v169_v50 = vadd.f32 %v168_v48, %v167_v46 }
 0x1cb   :  { %v170_v51 = vsub.f32 %v169_v50, %v166_v49 }
 0x1cd   :  { %v171_v52 = vmax.f32 %v170_v51, 0.0 }
 0x1cf   :  { %v173_v53 = vadd.f32 1e-06, %v171_v52 }
 0x1d1   :  { %291 = vrcp.f32 %v173_v53 }
 0x1db   :  { %v292_v55 = vpop.eup %291 }
 0x1dc   :  { %v175_v56 = vmul.f32 %v292_v55, %v172_v54 }
 0x1de   :  { %v176_v57 = vsel %vm40_vm0, %v175_v56, 0.0 }
 0x1df   :  { %177 = vadd.xlane.f32.xlu1 %v176_v57 }
 0x26c   :  { %v178_v58 = vpop.xlane.xlu1 %177 }
 0x26d   :  { %v179_v59 = vrot.slane %v178_v58, 4 }
 0x26f   :  { %v180_v60 = vadd.f32 %v179_v59, %v178_v58 }
 0x271   :  { %v181_v61 = vrot.slane %v180_v60, 2 }
 0x273   :  { %v182_v62 = vadd.f32 %v181_v61, %v180_v60 }
 0x275   :  { %v183_v63 = vrot.slane %v182_v62, 1 }
 0x277   :  { %v184_v0 = vadd.f32 %v183_v63, %v182_v62 }
 0x279   :  { %280 = vpush %v184_v0 }
 0x2aa   :  { %s281_s7 = spop %280 }
 0x2ab   :  { %v186_v1 = vstv %s281_s7 }
 0x2ac   :  { %187 = vst [vmem:[#allocation8] sm:$0x1] %v186_v1 }
 0x2ad   :  { %326 = shalt.err (!%p323_p12)
}
 0x2ae   :  { %s327_s12 = scalar_lea.hbm %s417_s4, 16 }
 0x2af   :  { %p328_p13 = scmp.ne.s32.totalorder %s417_s4, %s327_s12  ;;  %p331_p0 = scmp.lt.u32.totalorder %s327_s12, %s417_s4 }
 0x2b1   :  { %p333_p1 = pnand %p331_p0, %p328_p13 }
 0x2b3   :  { %336 = shalt.err (!%p333_p1)
}
 0x2b4   :  { %197 = dma.vmem_to_hbm [thread:$0]  %s195_s3, 16, %s417_s4, [#allocation7]  }
 0x2b5   :  { %339 = dma.done.wait [#allocation7], 16  }
 0x2b6   :  { %340 = vsyncadd [#allocation7], 4294967280 }
 0x2b7   :  { %201 = vsyncpa [#allocation6], 1 }
 0x2b8   :  { %202 = vsyncpa [#allocation7], 1 }

</bundles_post_ra>
